<compile_context>
chip_gen: v6e
topology: v6e:2x2x1
jax: 0.10.0
libtpu: 0.0.40
codegen_flags: <defaults>
</compile_context>

<pallas_src>
import jax
import jax.numpy as jnp
from jax.experimental import pallas as pl
from jax.experimental.pallas import tpu as pltpu

COMPUTE_DTYPE = jnp.bfloat16   # MXU-native on v5e/v6e/v7x; accumulate in f32.
_LANE = 128
_MAX_TILE = 2048               # per-block VMEM stays < ~1 MB even at 2048
_MIN_GRID_STEPS = 2            # v7x: 2 TensorCores/chip; give both work

_COMPILER_PARAMS = pltpu.CompilerParams(
    dimension_semantics=("parallel",),
    # 32 MiB keeps plenty of headroom even on v7x (64 MiB VMEM / TC); tiles
    # here are nowhere near the limit.
    vmem_limit_bytes=32 * 1024 * 1024,
)


def _round_up(v, m):
    return ((v + m - 1) // m) * m


def _pick_tile(size, unit=_LANE, min_steps=_MIN_GRID_STEPS):
    """Pad `size` to `unit` granularity and pick a lane-aligned tile.

    Aims for >= `min_steps` grid steps (so v7x's two TensorCores both get
    work) while capping the tile at _MAX_TILE.  Returns (padded_size, tile)
    with tile | padded_size and tile % unit == 0.
    """
    padded = _round_up(size, unit)
    tile = _round_up(-(-padded // min_steps), unit)   # ceil-div then align
    tile = max(unit, min(tile, _MAX_TILE))
    padded = _round_up(padded, tile)
    return padded, tile


# ---------------------------------------------------------------------------
# Fused conv + bias + ReLU + 2x2 max-pool
# ---------------------------------------------------------------------------

def _conv_relu_pool_kernel(cols_ref, w_ref, b_ref, o_ref):
    """out = relu(max_corner(W @ cols) + b), one MXU push per block.

    cols_ref: (K, 4*tm) bf16  -- 4 pooling corners laid contiguously on lanes
    w_ref:    (OC, K)   bf16
    b_ref:    (OC, 1)   f32
    o_ref:    (OC, tm)  bf16
    """
    tm = o_ref.shape[-1]
    r = jnp.dot(w_ref[...], cols_ref[...],
                preferred_element_type=jnp.float32)          # (OC, 4*tm)
    # 2x2 pool max over the 4 contiguous tm-lane corner slices (VPU work;
    # slices are at 128-aligned lane offsets, so no relayout).
    m = jnp.maximum(jnp.maximum(r[:, 0 * tm:1 * tm], r[:, 1 * tm:2 * tm]),
                    jnp.maximum(r[:, 2 * tm:3 * tm], r[:, 3 * tm:4 * tm]))
    o_ref[...] = jnp.maximum(m + b_ref[...], 0.0).astype(o_ref.dtype)


def conv_relu_pool(x_chwn, w2d, b_col):
    """Fused VALID 3x3 conv (stride 1) + bias + ReLU + 2x2 max-pool (floor).

    x_chwn: (C, H, W, N) bf16; w2d: (OC, C*9) bf16; b_col: (OC, 1) f32
    returns (OC, POH, POW, N) bf16 (channel-major, batch-last).
    """
    OC, K = w2d.shape
    C, H, W, N = x_chwn.shape
    KH = KW = 3
    OH, OW = H - KH + 1, W - KW + 1
    POH, POW = OH // 2, OW // 2                  # floor mode, like F.max_pool2d
    M = POH * POW * N
    m_pad, tm = _pick_tile(M)
    nb = m_pad // tm

    # Corner-partitioned transposed im2col, built directly in bf16.
    # Column ordering per corner is (poh, pow, n); row ordering is (c, ki, kj)
    # matching PyTorch weight.reshape(OC, IC*KH*KW).
    corners = []
    for pi in range(2):
        for pj in range(2):
            taps = []
            for ki in range(KH):
                for kj in range(KW):
                    patch = x_chwn[:,
                                   pi + ki: pi + ki + 2 * POH: 2,
                                   pj + kj: pj + kj + 2 * POW: 2,
                                   :]                         # (C,POH,POW,N)
                    taps.append(patch.reshape(C, M))
            corners.append(jnp.stack(taps, axis=1).reshape(K, M))
    cols = jnp.stack(corners, axis=0)                         # (4, K, M) bf16
    if m_pad != M:
        cols = jnp.pad(cols, ((0, 0), (0, 0), (0, m_pad - M)))
    # Interleave the 4 corners per tile so each grid block sees (K, 4*tm)
    # with corners in contiguous tm-lane runs -> single MXU push in-kernel.
    cols = (cols.reshape(4, K, nb, tm)
                .transpose(1, 2, 0, 3)
                .reshape(K, nb * 4 * tm))

    out = pl.pallas_call(
        _conv_relu_pool_kernel,
        out_shape=jax.ShapeDtypeStruct((OC, m_pad), COMPUTE_DTYPE),
        grid=(nb,),
        in_specs=[
            pl.BlockSpec((K, 4 * tm), lambda i: (0, i)),
            pl.BlockSpec((OC, K), lambda i: (0, 0)),
            pl.BlockSpec((OC, 1), lambda i: (0, 0)),
        ],
        out_specs=pl.BlockSpec((OC, tm), lambda i: (0, i)),
        compiler_params=_COMPILER_PARAMS,
    )(cols, w2d, b_col)
    return out[:, :M].reshape(OC, POH, POW, N)


# ---------------------------------------------------------------------------
# Fused FC head: fc1 + ReLU + fc2 + ReLU + fc3  (lane-dense on N)
# ---------------------------------------------------------------------------

def _fc_head_kernel(x_ref, w1_ref, b1_ref, w2_ref, b2_ref, w3_ref, b3_ref,
                    o_ref):
    """out.T = W3 @ relu(W2 @ relu(W1 @ x.T + b1) + b2) + b3.

    Batch sits on the lane axis everywhere; intermediates never leave VMEM.
    x_ref: (400, tn) bf16; w*: PyTorch-layout (out, in) bf16; b*: (out, 1) f32
    o_ref: (10, tn) f32
    """
    h = jnp.dot(w1_ref[...], x_ref[...], preferred_element_type=jnp.float32)
    h = jnp.maximum(h + b1_ref[...], 0.0).astype(w2_ref.dtype)
    h = jnp.dot(w2_ref[...], h, preferred_element_type=jnp.float32)
    h = jnp.maximum(h + b2_ref[...], 0.0).astype(w3_ref.dtype)
    h = jnp.dot(w3_ref[...], h, preferred_element_type=jnp.float32)
    o_ref[...] = (h + b3_ref[...]).astype(o_ref.dtype)


def fc_head(xT, p):
    """xT: (400, N) bf16 (batch last).  Returns (N, 10) f32."""
    K, N = xT.shape
    n_out = p["fc3_w"].shape[0]
    n_pad, tn = _pick_tile(N)
    if n_pad != N:
        xT = jnp.pad(xT, ((0, 0), (0, n_pad - N)))

    full = lambda i: (0, 0)
    out = pl.pallas_call(
        _fc_head_kernel,
        out_shape=jax.ShapeDtypeStruct((n_out, n_pad), jnp.float32),
        grid=(n_pad // tn,),
        in_specs=[
            pl.BlockSpec((K, tn), lambda i: (0, i)),
            pl.BlockSpec(p["fc1_w"].shape, full),
            pl.BlockSpec(p["fc1_b"].shape, full),
            pl.BlockSpec(p["fc2_w"].shape, full),
            pl.BlockSpec(p["fc2_b"].shape, full),
            pl.BlockSpec(p["fc3_w"].shape, full),
            pl.BlockSpec(p["fc3_b"].shape, full),
        ],
        out_specs=pl.BlockSpec((n_out, tn), lambda i: (0, i)),
        compiler_params=_COMPILER_PARAMS,
    )(xT, p["fc1_w"], p["fc1_b"], p["fc2_w"], p["fc2_b"],
      p["fc3_w"], p["fc3_b"])
    return out[:, :N].T


# ---------------------------------------------------------------------------
# Parameters + forward
# ---------------------------------------------------------------------------

def init_lenet_params(key):
    """PyTorch-layout params, U(-1/sqrt(fan_in), 1/sqrt(fan_in)) init."""
    def uniform(k, shape, fan_in):
        bound = 1.0 / float(fan_in) ** 0.5
        return jax.random.uniform(k, shape, jnp.float32, -bound, bound)

    ks = jax.random.split(key, 10)
    return {
        "conv1_w": uniform(ks[0], (6, 1, 3, 3), 1 * 3 * 3),
        "conv1_b": uniform(ks[1], (6,), 1 * 3 * 3),
        "conv2_w": uniform(ks[2], (16, 6, 3, 3), 6 * 3 * 3),
        "conv2_b": uniform(ks[3], (16,), 6 * 3 * 3),
        "fc1_w":   uniform(ks[4], (120, 16 * 5 * 5), 16 * 5 * 5),
        "fc1_b":   uniform(ks[5], (120,), 16 * 5 * 5),
        "fc2_w":   uniform(ks[6], (84, 120), 120),
        "fc2_b":   uniform(ks[7], (84,), 120),
        "fc3_w":   uniform(ks[8], (10, 84), 84),
        "fc3_b":   uniform(ks[9], (10,), 84),
    }


def prepare_params(params, dtype=COMPUTE_DTYPE):
    """One-time layout/dtype prep: conv w -> (OC, IC*KH*KW); fc w stays in
    PyTorch (out, in) layout (used as LHS of the transposed FC head); matmul
    operands in the MXU dtype, biases kept f32 as (out, 1) columns."""
    f32 = jnp.float32
    return {
        "conv1_w": params["conv1_w"].reshape(6, -1).astype(dtype),
        "conv1_b": params["conv1_b"].reshape(6, 1).astype(f32),
        "conv2_w": params["conv2_w"].reshape(16, -1).astype(dtype),
        "conv2_b": params["conv2_b"].reshape(16, 1).astype(f32),
        "fc1_w": params["fc1_w"].astype(dtype),
        "fc1_b": params["fc1_b"].reshape(-1, 1).astype(f32),
        "fc2_w": params["fc2_w"].astype(dtype),
        "fc2_b": params["fc2_b"].reshape(-1, 1).astype(f32),
        "fc3_w": params["fc3_w"].astype(dtype),
        "fc3_b": params["fc3_b"].reshape(-1, 1).astype(f32),
    }


@jax.jit
def lenet_forward(prep, x):
    # x: (N, 1, 28, 28) f32, NCHW (PyTorch convention).
    n = x.shape[0]
    # Cast ONCE to bf16 and go channel-major / batch-last for the whole net.
    x = jnp.transpose(x, (1, 2, 3, 0)).astype(COMPUTE_DTYPE)  # (1, 28, 28, N)
    x = conv_relu_pool(x, prep["conv1_w"], prep["conv1_b"])   # (6, 13, 13, N)
    x = conv_relu_pool(x, prep["conv2_w"], prep["conv2_b"])   # (16, 5,  5, N)
    # Free reshape: (16, 5, 5, N) -> (400, N) with row = c*25 + h*5 + w,
    # exactly PyTorch's x.view(N, 400) ordering (transposed).
    xT = x.reshape(16 * 5 * 5, n)
    return fc_head(xT, prep)                                  # (N, 10) f32


def lenet_reference(params, x):
    """Pure-JAX f32 reference matching the PyTorch module (for validation)."""
    def conv(x, w, b):
        y = jax.lax.conv_general_dilated(
            x, w, (1, 1), "VALID",
            dimension_numbers=("NCHW", "OIHW", "NCHW"))
        return y + b.reshape(1, -1, 1, 1)

    def pool(x):
        return jax.lax.reduce_window(
            x, -jnp.inf, jax.lax.max, (1, 1, 2, 2), (1, 1, 2, 2), "VALID")

    x = pool(jax.nn.relu(conv(x, params["conv1_w"], params["conv1_b"])))
    x = pool(jax.nn.relu(conv(x, params["conv2_w"], params["conv2_b"])))
    x = x.reshape(x.shape[0], -1)
    x = jax.nn.relu(x @ params["fc1_w"].T + params["fc1_b"])
    x = jax.nn.relu(x @ params["fc2_w"].T + params["fc2_b"])
    return x @ params["fc3_w"].T + params["fc3_b"]


if __name__ == "__main__":
    key = jax.random.PRNGKey(0)
    pkey, xkey = jax.random.split(key)
    params = init_lenet_params(pkey)
    prep = prepare_params(params)
    # 28x28 input is required so the flatten matches fc1's 16*5*5 input dim.
    x = jax.random.normal(xkey, (2, 1, 28, 28), jnp.float32)

    out = jax.block_until_ready(lenet_forward(prep, x))
    assert out.shape == (2, 10), out.shape
    assert out.dtype == jnp.float32, out.dtype

    ref = jax.block_until_ready(lenet_reference(params, x))
    err = float(jnp.max(jnp.abs(out - ref)))
    assert err < 5e-2, f"max |out - ref| = {err}"
    print("KERNEL_OK")
</pallas_src>

<mosaic_0001>
module attributes {stable_mosaic.version = 11 : i64} {
  func.func @_conv_relu_pool_kernel(%arg0: i32, %arg1: memref<9x1024xbf16, #tpu.memory_space<vmem>>, %arg2: memref<6x9xbf16, #tpu.memory_space<vmem>>, %arg3: memref<6x1xf32, #tpu.memory_space<vmem>>, %arg4: memref<6x256xbf16, #tpu.memory_space<vmem>>) attributes {dimension_semantics = [#tpu.dimension_semantics<parallel>], iteration_bounds = array<i64: 2>, scalar_prefetch = 0 : i64, scratch_operands = 0 : i64, tpu.core_type = #tpu.core_type<tc>, window_params = [{transform_indices = @transform_0, window_bounds = array<i64: 9, 1024>}, {pipeline_mode = #tpu.pipeline_mode<synchronous>, transform_indices = @transform_1, window_bounds = array<i64: 6, 9>}, {pipeline_mode = #tpu.pipeline_mode<synchronous>, transform_indices = @transform_2, window_bounds = array<i64: 6, 1>}, {transform_indices = @transform_3, window_bounds = array<i64: 6, 256>}]} {
    %c0 = arith.constant 0 : index
    %c0_0 = arith.constant 0 : index
    %0 = vector.load %arg2[%c0, %c0_0] : memref<6x9xbf16, #tpu.memory_space<vmem>>, vector<6x9xbf16>
    %c0_1 = arith.constant 0 : index
    %c0_2 = arith.constant 0 : index
    %1 = vector.load %arg1[%c0_1, %c0_2] : memref<9x1024xbf16, #tpu.memory_space<vmem>>, vector<9x1024xbf16>
    %cst = arith.constant dense<0.000000e+00> : vector<6x1024xf32>
    %2 = tpu.matmul %0, %1, %cst {dimension_numbers = #tpu.dot_dimension_numbers<[1], [0], [0], [1], [0, 0, 1, 1], [], []>} : vector<6x9xbf16>, vector<9x1024xbf16>, vector<6x1024xf32> -> vector<6x1024xf32>
    %3 = vector.extract_strided_slice %2 {offsets = [0, 0], sizes = [6, 256], strides = [1, 1]} : vector<6x1024xf32> to vector<6x256xf32>
    %4 = vector.extract_strided_slice %2 {offsets = [0, 256], sizes = [6, 256], strides = [1, 1]} : vector<6x1024xf32> to vector<6x256xf32>
    %5 = arith.maximumf %3, %4 : vector<6x256xf32>
    %6 = vector.extract_strided_slice %2 {offsets = [0, 512], sizes = [6, 256], strides = [1, 1]} : vector<6x1024xf32> to vector<6x256xf32>
    %7 = vector.extract_strided_slice %2 {offsets = [0, 768], sizes = [6, 256], strides = [1, 1]} : vector<6x1024xf32> to vector<6x256xf32>
    %8 = arith.maximumf %6, %7 : vector<6x256xf32>
    %9 = arith.maximumf %5, %8 : vector<6x256xf32>
    %c0_3 = arith.constant 0 : index
    %c0_4 = arith.constant 0 : index
    %10 = vector.load %arg3[%c0_3, %c0_4] : memref<6x1xf32, #tpu.memory_space<vmem>>, vector<6x1xf32>
    %11 = vector.broadcast %10 : vector<6x1xf32> to vector<6x256xf32>
    %12 = arith.addf %9, %11 : vector<6x256xf32>
    %cst_5 = arith.constant 0.000000e+00 : f32
    %13 = vector.broadcast %cst_5 : f32 to vector<6x256xf32>
    %14 = arith.maximumf %12, %13 : vector<6x256xf32>
    %15 = arith.truncf %14 : vector<6x256xf32> to vector<6x256xbf16>
    %c0_6 = arith.constant 0 : index
    %c0_7 = arith.constant 0 : index
    %16 = vector.load %arg4[%c0_6, %c0_7] : memref<6x256xbf16, #tpu.memory_space<vmem>>, vector<6x256xbf16>
    tpu.vector_store %arg4[%c0_6, %c0_7], %15 {strides = array<i32>} : memref<6x256xbf16, #tpu.memory_space<vmem>>, vector<6x256xbf16>,
    return
  }
  func.func @transform_0(%arg0: i32) -> (i32, i32) {
    %c0_i32 = arith.constant 0 : i32
    %c0_i32_0 = arith.constant 0 : i32
    return %c0_i32, %arg0 : i32, i32
  }
  func.func @transform_1(%arg0: i32) -> (i32, i32) {
    %c0_i32 = arith.constant 0 : i32
    %c0_i32_0 = arith.constant 0 : i32
    %c0_i32_1 = arith.constant 0 : i32
    return %c0_i32, %c0_i32_0 : i32, i32
  }
  func.func @transform_2(%arg0: i32) -> (i32, i32) {
    %c0_i32 = arith.constant 0 : i32
    %c0_i32_0 = arith.constant 0 : i32
    %c0_i32_1 = arith.constant 0 : i32
    return %c0_i32, %c0_i32_0 : i32, i32
  }
  func.func @transform_3(%arg0: i32) -> (i32, i32) {
    %c0_i32 = arith.constant 0 : i32
    %c0_i32_0 = arith.constant 0 : i32
    return %c0_i32, %arg0 : i32, i32
  }
}

module attributes {stable_mosaic.version = 11 : i64} {
  func.func @_conv_relu_pool_kernel(%arg0: i32, %arg1: memref<54x512xbf16, #tpu.memory_space<vmem>>, %arg2: memref<16x54xbf16, #tpu.memory_space<vmem>>, %arg3: memref<16x1xf32, #tpu.memory_space<vmem>>, %arg4: memref<16x128xbf16, #tpu.memory_space<vmem>>) attributes {dimension_semantics = [#tpu.dimension_semantics<parallel>], iteration_bounds = array<i64: 1>, scalar_prefetch = 0 : i64, scratch_operands = 0 : i64, tpu.core_type = #tpu.core_type<tc>, window_params = [{transform_indices = @transform_0, window_bounds = array<i64: 54, 512>}, {pipeline_mode = #tpu.pipeline_mode<synchronous>, transform_indices = @transform_1, window_bounds = array<i64: 16, 54>}, {pipeline_mode = #tpu.pipeline_mode<synchronous>, transform_indices = @transform_2, window_bounds = array<i64: 16, 1>}, {transform_indices = @transform_3, window_bounds = array<i64: 16, 128>}]} {
    %c0 = arith.constant 0 : index
    %c0_0 = arith.constant 0 : index
    %0 = vector.load %arg2[%c0, %c0_0] : memref<16x54xbf16, #tpu.memory_space<vmem>>, vector<16x54xbf16>
    %c0_1 = arith.constant 0 : index
    %c0_2 = arith.constant 0 : index
    %1 = vector.load %arg1[%c0_1, %c0_2] : memref<54x512xbf16, #tpu.memory_space<vmem>>, vector<54x512xbf16>
    %cst = arith.constant dense<0.000000e+00> : vector<16x512xf32>
    %2 = tpu.matmul %0, %1, %cst {dimension_numbers = #tpu.dot_dimension_numbers<[1], [0], [0], [1], [0, 0, 1, 1], [], []>} : vector<16x54xbf16>, vector<54x512xbf16>, vector<16x512xf32> -> vector<16x512xf32>
    %3 = vector.extract_strided_slice %2 {offsets = [0, 0], sizes = [16, 128], strides = [1, 1]} : vector<16x512xf32> to vector<16x128xf32>
    %4 = vector.extract_strided_slice %2 {offsets = [0, 128], sizes = [16, 128], strides = [1, 1]} : vector<16x512xf32> to vector<16x128xf32>
    %5 = arith.maximumf %3, %4 : vector<16x128xf32>
    %6 = vector.extract_strided_slice %2 {offsets = [0, 256], sizes = [16, 128], strides = [1, 1]} : vector<16x512xf32> to vector<16x128xf32>
    %7 = vector.extract_strided_slice %2 {offsets = [0, 384], sizes = [16, 128], strides = [1, 1]} : vector<16x512xf32> to vector<16x128xf32>
    %8 = arith.maximumf %6, %7 : vector<16x128xf32>
    %9 = arith.maximumf %5, %8 : vector<16x128xf32>
    %c0_3 = arith.constant 0 : index
    %c0_4 = arith.constant 0 : index
    %10 = vector.load %arg3[%c0_3, %c0_4] : memref<16x1xf32, #tpu.memory_space<vmem>>, vector<16x1xf32>
    %11 = vector.broadcast %10 : vector<16x1xf32> to vector<16x128xf32>
    %12 = arith.addf %9, %11 : vector<16x128xf32>
    %cst_5 = arith.constant 0.000000e+00 : f32
    %13 = vector.broadcast %cst_5 : f32 to vector<16x128xf32>
    %14 = arith.maximumf %12, %13 : vector<16x128xf32>
    %15 = arith.truncf %14 : vector<16x128xf32> to vector<16x128xbf16>
    %c0_6 = arith.constant 0 : index
    %c0_7 = arith.constant 0 : index
    %16 = vector.load %arg4[%c0_6, %c0_7] : memref<16x128xbf16, #tpu.memory_space<vmem>>, vector<16x128xbf16>
    tpu.vector_store %arg4[%c0_6, %c0_7], %15 {strides = array<i32>} : memref<16x128xbf16, #tpu.memory_space<vmem>>, vector<16x128xbf16>,
    return
  }
  func.func @transform_0(%arg0: i32) -> (i32, i32) {
    %c0_i32 = arith.constant 0 : i32
    %c0_i32_0 = arith.constant 0 : i32
    return %c0_i32, %arg0 : i32, i32
  }
  func.func @transform_1(%arg0: i32) -> (i32, i32) {
    %c0_i32 = arith.constant 0 : i32
    %c0_i32_0 = arith.constant 0 : i32
    %c0_i32_1 = arith.constant 0 : i32
    return %c0_i32, %c0_i32_0 : i32, i32
  }
  func.func @transform_2(%arg0: i32) -> (i32, i32) {
    %c0_i32 = arith.constant 0 : i32
    %c0_i32_0 = arith.constant 0 : i32
    %c0_i32_1 = arith.constant 0 : i32
    return %c0_i32, %c0_i32_0 : i32, i32
  }
  func.func @transform_3(%arg0: i32) -> (i32, i32) {
    %c0_i32 = arith.constant 0 : i32
    %c0_i32_0 = arith.constant 0 : i32
    return %c0_i32, %arg0 : i32, i32
  }
}

module attributes {stable_mosaic.version = 11 : i64} {
  func.func @_fc_head_kernel(%arg0: i32, %arg1: memref<400x128xbf16, #tpu.memory_space<vmem>>, %arg2: memref<120x400xbf16, #tpu.memory_space<vmem>>, %arg3: memref<120x1xf32, #tpu.memory_space<vmem>>, %arg4: memref<84x120xbf16, #tpu.memory_space<vmem>>, %arg5: memref<84x1xf32, #tpu.memory_space<vmem>>, %arg6: memref<10x84xbf16, #tpu.memory_space<vmem>>, %arg7: memref<10x1xf32, #tpu.memory_space<vmem>>, %arg8: memref<10x128xf32, #tpu.memory_space<vmem>>) attributes {dimension_semantics = [#tpu.dimension_semantics<parallel>], iteration_bounds = array<i64: 1>, scalar_prefetch = 0 : i64, scratch_operands = 0 : i64, tpu.core_type = #tpu.core_type<tc>, window_params = [{transform_indices = @transform_0, window_bounds = array<i64: 400, 128>}, {pipeline_mode = #tpu.pipeline_mode<synchronous>, transform_indices = @transform_1, window_bounds = array<i64: 120, 400>}, {pipeline_mode = #tpu.pipeline_mode<synchronous>, transform_indices = @transform_2, window_bounds = array<i64: 120, 1>}, {pipeline_mode = #tpu.pipeline_mode<synchronous>, transform_indices = @transform_3, window_bounds = array<i64: 84, 120>}, {pipeline_mode = #tpu.pipeline_mode<synchronous>, transform_indices = @transform_4, window_bounds = array<i64: 84, 1>}, {pipeline_mode = #tpu.pipeline_mode<synchronous>, transform_indices = @transform_5, window_bounds = array<i64: 10, 84>}, {pipeline_mode = #tpu.pipeline_mode<synchronous>, transform_indices = @transform_6, window_bounds = array<i64: 10, 1>}, {transform_indices = @transform_7, window_bounds = array<i64: 10, 128>}]} {
    %c0 = arith.constant 0 : index
    %c0_0 = arith.constant 0 : index
    %0 = vector.load %arg2[%c0, %c0_0] : memref<120x400xbf16, #tpu.memory_space<vmem>>, vector<120x400xbf16>
    %c0_1 = arith.constant 0 : index
    %c0_2 = arith.constant 0 : index
    %1 = vector.load %arg1[%c0_1, %c0_2] : memref<400x128xbf16, #tpu.memory_space<vmem>>, vector<400x128xbf16>
    %cst = arith.constant dense<0.000000e+00> : vector<120x128xf32>
    %2 = tpu.matmul %0, %1, %cst {dimension_numbers = #tpu.dot_dimension_numbers<[1], [0], [0], [1], [0, 0, 1, 1], [], []>} : vector<120x400xbf16>, vector<400x128xbf16>, vector<120x128xf32> -> vector<120x128xf32>
    %c0_3 = arith.constant 0 : index
    %c0_4 = arith.constant 0 : index
    %3 = vector.load %arg3[%c0_3, %c0_4] : memref<120x1xf32, #tpu.memory_space<vmem>>, vector<120x1xf32>
    %4 = vector.broadcast %3 : vector<120x1xf32> to vector<120x128xf32>
    %5 = arith.addf %2, %4 : vector<120x128xf32>
    %cst_5 = arith.constant 0.000000e+00 : f32
    %6 = vector.broadcast %cst_5 : f32 to vector<120x128xf32>
    %7 = arith.maximumf %5, %6 : vector<120x128xf32>
    %8 = arith.truncf %7 : vector<120x128xf32> to vector<120x128xbf16>
    %c0_6 = arith.constant 0 : index
    %c0_7 = arith.constant 0 : index
    %9 = vector.load %arg4[%c0_6, %c0_7] : memref<84x120xbf16, #tpu.memory_space<vmem>>, vector<84x120xbf16>
    %cst_8 = arith.constant dense<0.000000e+00> : vector<84x128xf32>
    %10 = tpu.matmul %9, %8, %cst_8 {dimension_numbers = #tpu.dot_dimension_numbers<[1], [0], [0], [1], [0, 0, 1, 1], [], []>} : vector<84x120xbf16>, vector<120x128xbf16>, vector<84x128xf32> -> vector<84x128xf32>
    %c0_9 = arith.constant 0 : index
    %c0_10 = arith.constant 0 : index
    %11 = vector.load %arg5[%c0_9, %c0_10] : memref<84x1xf32, #tpu.memory_space<vmem>>, vector<84x1xf32>
    %12 = vector.broadcast %11 : vector<84x1xf32> to vector<84x128xf32>
    %13 = arith.addf %10, %12 : vector<84x128xf32>
    %cst_11 = arith.constant 0.000000e+00 : f32
    %14 = vector.broadcast %cst_11 : f32 to vector<84x128xf32>
    %15 = arith.maximumf %13, %14 : vector<84x128xf32>
    %16 = arith.truncf %15 : vector<84x128xf32> to vector<84x128xbf16>
    %c0_12 = arith.constant 0 : index
    %c0_13 = arith.constant 0 : index
    %17 = vector.load %arg6[%c0_12, %c0_13] : memref<10x84xbf16, #tpu.memory_space<vmem>>, vector<10x84xbf16>
    %cst_14 = arith.constant dense<0.000000e+00> : vector<10x128xf32>
    %18 = tpu.matmul %17, %16, %cst_14 {dimension_numbers = #tpu.dot_dimension_numbers<[1], [0], [0], [1], [0, 0, 1, 1], [], []>} : vector<10x84xbf16>, vector<84x128xbf16>, vector<10x128xf32> -> vector<10x128xf32>
    %c0_15 = arith.constant 0 : index
    %c0_16 = arith.constant 0 : index
    %19 = vector.load %arg7[%c0_15, %c0_16] : memref<10x1xf32, #tpu.memory_space<vmem>>, vector<10x1xf32>
    %20 = vector.broadcast %19 : vector<10x1xf32> to vector<10x128xf32>
    %21 = arith.addf %18, %20 : vector<10x128xf32>
    %c0_17 = arith.constant 0 : index
    %c0_18 = arith.constant 0 : index
    %22 = vector.load %arg8[%c0_17, %c0_18] : memref<10x128xf32, #tpu.memory_space<vmem>>, vector<10x128xf32>
    tpu.vector_store %arg8[%c0_17, %c0_18], %21 {strides = array<i32>} : memref<10x128xf32, #tpu.memory_space<vmem>>, vector<10x128xf32>,
    return
  }
  func.func @transform_0(%arg0: i32) -> (i32, i32) {
    %c0_i32 = arith.constant 0 : i32
    %c0_i32_0 = arith.constant 0 : i32
    return %c0_i32, %arg0 : i32, i32
  }
  func.func @transform_1(%arg0: i32) -> (i32, i32) {
    %c0_i32 = arith.constant 0 : i32
    %c0_i32_0 = arith.constant 0 : i32
    %c0_i32_1 = arith.constant 0 : i32
    return %c0_i32, %c0_i32_0 : i32, i32
  }
  func.func @transform_2(%arg0: i32) -> (i32, i32) {
    %c0_i32 = arith.constant 0 : i32
    %c0_i32_0 = arith.constant 0 : i32
    %c0_i32_1 = arith.constant 0 : i32
    return %c0_i32, %c0_i32_0 : i32, i32
  }
  func.func @transform_3(%arg0: i32) -> (i32, i32) {
    %c0_i32 = arith.constant 0 : i32
    %c0_i32_0 = arith.constant 0 : i32
    %c0_i32_1 = arith.constant 0 : i32
    return %c0_i32, %c0_i32_0 : i32, i32
  }
  func.func @transform_4(%arg0: i32) -> (i32, i32) {
    %c0_i32 = arith.constant 0 : i32
    %c0_i32_0 = arith.constant 0 : i32
    %c0_i32_1 = arith.constant 0 : i32
    return %c0_i32, %c0_i32_0 : i32, i32
  }
  func.func @transform_5(%arg0: i32) -> (i32, i32) {
    %c0_i32 = arith.constant 0 : i32
    %c0_i32_0 = arith.constant 0 : i32
    %c0_i32_1 = arith.constant 0 : i32
    return %c0_i32, %c0_i32_0 : i32, i32
  }
  func.func @transform_6(%arg0: i32) -> (i32, i32) {
    %c0_i32 = arith.constant 0 : i32
    %c0_i32_0 = arith.constant 0 : i32
    %c0_i32_1 = arith.constant 0 : i32
    return %c0_i32, %c0_i32_0 : i32, i32
  }
  func.func @transform_7(%arg0: i32) -> (i32, i32) {
    %c0_i32 = arith.constant 0 : i32
    %c0_i32_0 = arith.constant 0 : i32
    return %c0_i32, %arg0 : i32, i32
  }
}

</mosaic_0001>

<bundles_post_ra>
// kernel: lenet_forward.3
= control target key start
LH: loop header
LB: loop body
LE: loop exit
PB: predicated region body
PF: predicated region fallthrough
CT: control target
= control target key end

     0   :  { %s633_s12 = smov 0   ;;  %s635_s13 = smov 0   ;;  %s691_s0 = inlined_call_operand.vmem [shape: bf16[9,2048], index: 0, kind: input, shape index: {}]   ;;  %s692_s1 = inlined_call_operand.vmem [shape: bf16[6,9], index: 1, kind: input, shape index: {}]   ;;  %s693_s2 = inlined_call_operand.vmem [shape: f32[6,1], index: 2, kind: input, shape index: {}]   ;;  %s694_s3 = inlined_call_operand.vmem [shape: bf16[6,512], index: 3, kind: output, shape index: {}]  }
   0x1   :  { %s637_s14 = smov 0  }
   0x2 LB: > { %s532_s15 = sadd.s32 4294967295, %s609_s14   ;;  %s650_s16 = sadd.s32 1, %s609_s14   ;;  %s609_s14 = sphi %s637_s14, %s697_s14   ;;  %s605_s13 = sphi %s635_s13, %s696_s13   ;;  %s601_s12 = sphi %s633_s12, %s695_s12  }
   0x3   : > { %s17_s17 = ssub.s32 %s609_s14, %s650_s16  ;;  %s20_s18 = sadd.s32 1, %s605_s13 }
   0x4   : > { %p18_p0 = scmp.eq.s32.totalorder %s17_s17, 0  ;;  %p27_p1 = scmp.ne.s32.totalorder %s605_s13, %s601_s12 }
   0x5   : > { %p28_p2 = scmp.eq.s32.totalorder %s609_s14, 0  ;;  %p535_p4 = scmp.ge.s32.totalorder %s609_s14, 2 }
   0x6   : > { %s659_s19 = scalar_select %p18_p0, %s605_s13, %s20_s18  }
   0x7   : > { %p29_p3 = por %p28_p2, %p27_p1  ;;  %127 = sbr.rel (%p535_p4) target bundleno = 20 (0x14), region = 24 }
   0xc   : > { %130 = sbr.rel (!%p29_p3) target bundleno = 20 (0x14), region = 28  ;;  %s132_s20 = sand.u32 (%p29_p3), 1, %s605_s13  }
   0xd   : > { %s558_s21 = sshll.u32 (%p29_p3), %s609_s14, 5  ;;  %s536_s22 = sshll.u32 (%p29_p3), %s132_s20, 6 }
   0xe   : > { %s137_s25 = scalar_lea.vmem (%p29_p3), %s691_s0, %s558_s21  ;;  %s134_s26 = scalar_lea.vmem (%p29_p3), [#allocation2], %s536_s22 }
   0xf   : > { %v150_v0 = vld [vmem:[%s137_s25] sm:$0xff] (%p29_p3)  ;;  %v152_v1 = vld [vmem:[%s137_s25 + $0x8] sm:$0xff] (%p29_p3)  ;;  %v154_v2 = vld [vmem:[%s137_s25 + $0x10] sm:$0xff] (%p29_p3) }
  0x10   : > { %151 = vst [vmem:[%s134_s26] sm:$0xff] (%p29_p3), %v150_v0  ;;  %153 = vst [vmem:[%s134_s26 + $0x8] sm:$0xff] (%p29_p3), %v152_v1  ;;  %v156_v3 = vld [vmem:[%s137_s25 + $0x18] sm:$0xff] (%p29_p3)  ;;  %v158_v4 = vld [vmem:[%s137_s25 + $0x40] sm:$0xff] (%p29_p3) }
  0x11   : > { %155 = vst [vmem:[%s134_s26 + $0x10] sm:$0xff] %v154_v2  ;;  %v160_v5 = vld [vmem:[%s137_s25 + $0x48] sm:$0xff]  ;;  %157 = vst [vmem:[%s134_s26 + $0x18] sm:$0xff] %v156_v3  ;;  %v162_v6 = vld [vmem:[%s137_s25 + $0x50] sm:$0xff] }
  0x12   : > { %159 = vst [vmem:[%s134_s26 + $0x20] sm:$0xff] %v158_v4  ;;  %161 = vst [vmem:[%s134_s26 + $0x28] sm:$0xff] %v160_v5  ;;  %v164_v7 = vld [vmem:[%s137_s25 + $0x58] sm:$0xff] }
  0x13   : > { %163 = vst [vmem:[%s134_s26 + $0x30] sm:$0xff] %v162_v6  ;;  %165 = vst [vmem:[%s134_s26 + $0x38] sm:$0xff] %v164_v7 }
  0x14 PF: > { %p539_p5 = scmp.ge.s32.totalorder %s609_s14, 1  ;;  %p170_p6 = scmp.lt.s32.totalorder %s609_s14, 3 }
  0x16   : > { %p171_p7 = pnand %p539_p5, %p170_p6 }
  0x17   : > { %s177_s27 = sand.u32 (!%p171_p7), 1, %s601_s12   ;;  %s541_s7 = sshll.u32 (!%p171_p7), %s532_s15, 1 }
  0x18   : > { %174 = sbr.rel (%p171_p7) target bundleno = 254 (0xfe), region = 51  ;;  %s540_s28 = sshll.u32 (!%p171_p7), %s177_s27, 6 }
  0x19   : > { %s179_s4 = scalar_lea.vmem (!%p171_p7), [#allocation2], %s540_s28  ;;  %p202_p8 = scmp.lt.s32.totalorder (!%p171_p7), %s541_s7, 3 }
  0x1d   : > { %vm253_vm0 = vcmask 1043456   ;;  %vm254_vm1 = vcmask 1044480   ;;  %v611_v8 = vmov 65535   ;;  %v612_v10 = vmov 0   ;;  %v451_v11 = vld [vmem:[%s693_s2] sm:$0x3f] }
  0x1e   : > { %v255_v9 = vsel %vm253_vm0, 4294967295, %v611_v8  ;;  %313 = vmatprep.mubr.bf16.mxu0 %v612_v10  ;;  %354 = vmatprep.mubr.bf16.mxu1 %v612_v10  ;;  %v209_v12 = vld [vmem:[%s179_s4] sm:$0xff]  ;;  %v210_v15 = vld [vmem:[%s179_s4 + $0x8] sm:$0xff]  ;;  %v211_v19 = vld [vmem:[%s179_s4 + $0x10] sm:$0xff]  ;;  %vm249_vm2 = vcmask 72704   ;;  %s699_s7 = smov (!%p202_p8, %s541_s7), 3 }
  0x1f   : > { %586 = vset.pattern.permute.xlu0 %v612_v10  ;;  %v213_v13 = vld [vmem:[%s179_s4 + $0x20] sm:$0x11]  ;;  %v256_v14 = vsel %vm254_vm1, %v255_v9, 0  ;;  %v214_v17 = vld [vmem:[%s179_s4 + $0x28] sm:$0x11]  ;;  %v212_v25 = vld [vmem:[%s179_s4 + $0x18] sm:$0xff] }
  0x20   : > { %454 = vperm.xlu0 %586, %v451_v11   ;;  %v544_v16 = vcombine.high %v209_v12, %v213_v13  ;;  %v543_v18 = vcombine.low %v209_v12, %v213_v13  ;;  %v215_v20 = vld [vmem:[%s179_s4 + $0x30] sm:$0x11]  ;;  %v546_v21 = vcombine.high %v210_v15, %v214_v17  ;;  %v545_v22 = vcombine.low %v210_v15, %v214_v17  ;;  %v216_v26 = vld [vmem:[%s179_s4 + $0x38] sm:$0x11]  ;;  %v208_v35 = vld [vmem:[%s692_s1] sm:$0x7] }
  0x21   : > { %v547_v23 = vcombine.low %v211_v19, %v215_v20  ;;  %v548_v24 = vcombine.high %v211_v19, %v215_v20  ;;  %v549_v29 = vcombine.low %v212_v25, %v216_v26  ;;  %v550_v30 = vcombine.high %v212_v25, %v216_v26  ;;  %s542_s8 = sshll.u32 %s699_s7, 2 }
  0x22   : > { %v261_v27 = vand.u32 %v544_v16, %v256_v14  ;;  %v258_v28 = vand.u32 %v543_v18, %v256_v14  ;;  %v267_v31 = vand.u32 %v546_v21, %v256_v14  ;;  %v264_v32 = vand.u32 %v545_v22, %v256_v14  ;;  %s205_s11 = scalar_lea.vmem %s694_s3, %s542_s8 }
  0x23   : > { %v273_v33 = vand.u32 %v548_v24, %v256_v14  ;;  %v279_v34 = vand.u32 %v550_v30, %v256_v14  ;;  %v270_v36 = vand.u32 %v547_v23, %v256_v14  ;;  %v276_v37 = vand.u32 %v549_v29, %v256_v14 }
  0x24   : > { %295 = vmatprep.subr.bf16.mxu0 %v261_v27  ;;  %336 = vmatprep.subr.bf16.mxu1 %v267_v31 }
  0x25   : > { %296 = vmatpush1.bf16.msra.mxu0 %v258_v28  ;;  %337 = vmatpush1.bf16.msra.mxu1 %v264_v32 }
  0x26   : > { %377 = vmatprep.subr.bf16.mxu0 %v273_v33  ;;  %418 = vmatprep.subr.bf16.mxu1 %v279_v34 }
  0x28   : > { %551 = vmatmul.mubr.msk.bf16.vlgmr.msra.gmra.mxu0 %vm249_vm2, %v208_v35  ;;  %552 = vmatmul.mubr.msk.bf16.vlgmr.msra.gmra.mxu1 %vm249_vm2, %v208_v35 }
  0x29   : > { %378 = vmatpush1.bf16.msra.mxu0 %v270_v36  ;;  %419 = vmatpush1.bf16.msra.mxu1 %v276_v37 }
  0x2a   : > { %395 = vmatprep.mubr.bf16.mxu0 %v612_v10  ;;  %436 = vmatprep.mubr.bf16.mxu1 %v612_v10 }
  0x30   : > { %553 = vmatmul.mubr.msk.bf16.vlgmr.msra.gmra.mxu0 %vm249_vm2, %v208_v35  ;;  %554 = vmatmul.mubr.msk.bf16.vlgmr.msra.gmra.mxu1 %vm249_vm2, %v208_v35 }
  0x9b   : > { %v455_v52 = vpop.permute.xlu0 %454 }
  0xe8   : > { %v315_v38 = vpop.f32.mrf.mxu0  ;;  %v356_v39 = vpop.f32.mrf.mxu1 }
  0xe9   : > { %v445_v48 = vmax.f32 %v315_v38, %v356_v39 }
  0xea   : > { %v317_v40 = vpop.f32.mrf.mxu0  ;;  %v358_v41 = vpop.f32.mrf.mxu1 }
  0xeb   : > { %v446_v53 = vmax.f32 %v317_v40, %v358_v41 }
  0xec   : > { %v319_v42 = vpop.f32.mrf.mxu0  ;;  %v360_v43 = vpop.f32.mrf.mxu1 }
  0xee   : > { %v320_v44 = vpop.f32.mrf.mxu0  ;;  %v361_v45 = vpop.f32.mrf.mxu1 }
  0xf0   : > { %v397_v46 = vpop.f32.mrf.mxu0  ;;  %v438_v47 = vpop.f32.mrf.mxu1 }
  0xf1   : > { %v447_v49 = vmax.f32 %v397_v46, %v438_v47 }
  0xf2   : > { %v399_v50 = vpop.f32.mrf.mxu0  ;;  %v440_v51 = vpop.f32.mrf.mxu1 }
  0xf3   : > { %v448_v54 = vmax.f32 %v399_v50, %v440_v51  ;;  %v449_v55 = vmax.f32 %v445_v48, %v447_v49 }
  0xf4   : > { %v401_v56 = vpop.f32.mrf.mxu0  ;;  %v442_v57 = vpop.f32.mrf.mxu1 }
  0xf5   : > { %v450_v58 = vmax.f32 %v446_v53, %v448_v54  ;;  %v457_v59 = vadd.f32 %v455_v52, %v449_v55 }
  0xf6   : > { %v402_v60 = vpop.f32.mrf.mxu0  ;;  %v443_v61 = vpop.f32.mrf.mxu1 }
  0xf7   : > { %v458_v62 = vadd.f32 %v455_v52, %v450_v58  ;;  %v459_v63 = vmax.f32 %v457_v59, 0.0 }
  0xf9   : > { %v460_v0 = vmax.f32 %v458_v62, 0.0 }
  0xfb   : > { %v559_v1 = vpack.c.bf16 %v460_v0, %v459_v63 }
  0xfd   : > { %469 = vst [vmem:[%s205_s11] sm:$0x77] %v559_v1 }
  0xfe PF: > { %p10_p9 = scmp.ge.s32.totalorder %s650_s16, 4   ;;  %s695_s12 = smov %s605_s13 }
  0xff   : > { %s696_s13 = smov %s659_s19  ;;  %s697_s14 = smov %s650_s16 }
 0x100   :  { %12 = sbr.rel (!%p10_p9) target bundleno = 2 (0x2), region = 90 }

// kernel: lenet_forward.4
= control target key start
LH: loop header
LB: loop body
LE: loop exit
PB: predicated region body
PF: predicated region fallthrough
CT: control target
= control target key end

     0   :  { %vm110_vm0 = vcmask 1042432   ;;  %v300_v2 = vmov 0   ;;  %vm106_vm1 = vcmask 441344   ;;  %s375_s0 = inlined_call_operand.vmem [shape: bf16[54,512], index: 0, kind: input, shape index: {}]   ;;  %s376_s2 = inlined_call_operand.vmem [shape: f32[16,1], index: 2, kind: input, shape index: {}]   ;;  %s377_s1 = inlined_call_operand.vmem [shape: bf16[16,54], index: 1, kind: input, shape index: {}]   ;;  %s378_s3 = inlined_call_operand.vmem [shape: bf16[16,128], index: 3, kind: output, shape index: {}]  }
   0x1   :  { %v29_v0 = vld [vmem:[%s375_s0 + $0x60] sm:$0x77]  ;;  %v30_v1 = vld [vmem:[%s375_s0 + $0x68] sm:$0x77]  ;;  %155 = vmatprep.mubr.bf16.mxu0 %v300_v2  ;;  %198 = vmatprep.mubr.bf16.mxu1 %v300_v2 }
   0x2   :  { %v259_v3 = vcombine.high %v29_v0, %v29_v0  ;;  %v261_v4 = vcombine.high %v30_v1, %v30_v1  ;;  %v258_v5 = vcombine.low %v29_v0, %v29_v0  ;;  %v260_v6 = vcombine.low %v30_v1, %v30_v1  ;;  %v281_v7 = vld [vmem:[%s375_s0 + $0x44] ss:$16 sps:$4 sm:$0xff]   ;;  %276 = vset.pattern.permute.xlu0 %v300_v2  ;;  %v283_v8 = vld [vmem:[%s375_s0 + $0x4c] ss:$16 sps:$4 sm:$0xff]   ;;  %v285_v11 = vld [vmem:[%s375_s0 + $0x40] ss:$16 sps:$4 sm:$0xff]  }
   0x3   :  { %v286_v12 = vld [vmem:[%s375_s0 + $0x48] ss:$16 sps:$4 sm:$0xff]   ;;  %v287_v13 = vld [vmem:[%s375_s0 + $0x24] ss:$16 sps:$4 sm:$0xff]   ;;  %v289_v14 = vld [vmem:[%s375_s0 + $0x2c] ss:$16 sps:$4 sm:$0xff]  }
   0x4   :  { %262 = vmatprep.subr.msk.bf16.mxu0 %vm110_vm0, %v259_v3  ;;  %264 = vmatprep.subr.msk.bf16.mxu1 %vm110_vm0, %v261_v4  ;;  %v112_v9 = vsel %vm110_vm0, %v258_v5, 0  ;;  %v118_v10 = vsel %vm110_vm0, %v260_v6, 0  ;;  %v291_v15 = vld [vmem:[%s375_s0 + $0x20] ss:$16 sps:$4 sm:$0xff]   ;;  %v292_v16 = vld [vmem:[%s375_s0 + $0x28] ss:$16 sps:$4 sm:$0xff]  }
   0x5   :  { %132 = vmatpush1.bf16.msra.mxu0 %v112_v9  ;;  %175 = vmatpush1.bf16.msra.mxu1 %v118_v10  ;;  %v293_v17 = vld [vmem:[%s375_s0 + $0x4] ss:$16 sps:$4 sm:$0xff]   ;;  %v295_v18 = vld [vmem:[%s375_s0 + $0xc] ss:$16 sps:$4 sm:$0xff]   ;;  %v297_v21 = vld [vmem:[%s375_s0] ss:$16 sps:$4 sm:$0xff]  }
   0x6   :  { %133 = vmatprep.subr.bf16.mxu0 %v281_v7  ;;  %176 = vmatprep.subr.bf16.mxu1 %v283_v8  ;;  %v215_v19 = vld [vmem:[%s376_s2] sm:$0xff]  ;;  %v216_v20 = vld [vmem:[%s376_s2 + $0x8] sm:$0xff] }
   0x7   :  { %219 = vperm.xlu0 %276, %v215_v19   ;;  %v298_v22 = vld [vmem:[%s375_s0 + $0x8] ss:$16 sps:$4 sm:$0xff]   ;;  %v299_v23 = vld [vmem:[%s377_s1] sm:$0xff]  }
   0x9   :  { %134 = vmatpush1.bf16.msra.mxu0 %v285_v11  ;;  %177 = vmatpush1.bf16.msra.mxu1 %v286_v12 }
   0xa   :  { %135 = vmatprep.subr.bf16.mxu0 %v287_v13  ;;  %178 = vmatprep.subr.bf16.mxu1 %v289_v14 }
   0xb   :  { %224 = vperm.xlu0 %276, %v216_v20  }
   0xd   :  { %136 = vmatpush1.bf16.msra.mxu0 %v291_v15  ;;  %179 = vmatpush1.bf16.msra.mxu1 %v292_v16 }
   0xe   :  { %137 = vmatprep.subr.bf16.mxu0 %v293_v17  ;;  %180 = vmatprep.subr.bf16.mxu1 %v295_v18 }
  0x11   :  { %138 = vmatpush1.bf16.msra.mxu0 %v297_v21  ;;  %181 = vmatpush1.bf16.msra.mxu1 %v298_v22 }
  0x14   :  { %263 = vmatmul.mubr.msk.bf16.vlgmr.msra.gmra.mxu0 %vm106_vm1, %v299_v23  ;;  %265 = vmatmul.mubr.msk.bf16.vlgmr.msra.gmra.mxu1 %vm106_vm1, %v299_v23 }
  0x82   :  { %v220_v28 = vpop.permute.xlu0 %219 }
  0x86   :  { %v225_v40 = vpop.permute.xlu0 %224 }
  0xd4   :  { %v157_v24 = vpop.f32.mrf.mxu0  ;;  %v200_v25 = vpop.f32.mrf.mxu1 }
  0xd6   :  { %v159_v26 = vpop.f32.mrf.mxu0  ;;  %v202_v27 = vpop.f32.mrf.mxu1 }
  0xd7   :  { %v209_v29 = vmax.f32 %v157_v24, %v159_v26  ;;  %v211_v30 = vmax.f32 %v200_v25, %v202_v27 }
  0xd8   :  { %v161_v31 = vpop.f32.mrf.mxu0  ;;  %v204_v32 = vpop.f32.mrf.mxu1 }
  0xd9   :  { %v213_v33 = vmax.f32 %v209_v29, %v211_v30 }
  0xda   :  { %v163_v34 = vpop.f32.mrf.mxu0  ;;  %v206_v35 = vpop.f32.mrf.mxu1 }
  0xdb   :  { %v210_v36 = vmax.f32 %v161_v31, %v163_v34  ;;  %v212_v37 = vmax.f32 %v204_v32, %v206_v35  ;;  %v227_v38 = vadd.f32 %v220_v28, %v213_v33 }
  0xdd   :  { %v214_v39 = vmax.f32 %v210_v36, %v212_v37  ;;  %v229_v42 = vmax.f32 %v227_v38, 0.0 }
  0xdf   :  { %v228_v41 = vadd.f32 %v225_v40, %v214_v39 }
  0xe1   :  { %v230_v43 = vmax.f32 %v228_v41, 0.0 }
  0xe3   :  { %v273_v44 = vpack.c.bf16 %v230_v43, %v229_v42 }
  0xe5   :  { %274 = vst [vmem:[%s378_s3] sm:$0xff] %v273_v44  }

// kernel: lenet_forward.5
= control target key start
LH: loop header
LB: loop body
LE: loop exit
PB: predicated region body
PF: predicated region fallthrough
CT: control target
= control target key end

     0   :  { %v1324_v0 = vmov 0   ;;  %vm493_vm0 = vcmask 130048   ;;  %vm838_vm1 = vcmask 982016   ;;  %vm857_vm2 = vcmask 1043456   ;;  %s1743_s0 = inlined_call_operand.vmem [shape: bf16[400,128], index: 0, kind: input, shape index: {}]   ;;  %s1744_s1 = inlined_call_operand.vmem [shape: bf16[120,400], index: 1, kind: input, shape index: {}]   ;;  %s1745_s2 = inlined_call_operand.vmem [shape: f32[120,1], index: 2, kind: input, shape index: {}]   ;;  %s1746_s4 = inlined_call_operand.vmem [shape: f32[84,1], index: 4, kind: input, shape index: {}]   ;;  %s1747_s6 = inlined_call_operand.vmem [shape: f32[10,1], index: 6, kind: input, shape index: {}]   ;;  %s1748_s3 = inlined_call_operand.vmem [shape: bf16[84,120], index: 3, kind: input, shape index: {}]   ;;  %s1749_s5 = inlined_call_operand.vmem [shape: bf16[10,84], index: 5, kind: input, shape index: {}]   ;;  %s1750_s7 = inlined_call_operand.vmem [shape: f32[10,128], index: 7, kind: output, shape index: {}]  }
   0x1   :  { %614 = vmatprep.subr.bf16.mxu1 %v1324_v0  ;;  %v1246_v1 = vld [vmem:[%s1743_s0 + $0x78] sm:$0xff]   ;;  %1245 = vset.pattern.permute.xlu1 %v1324_v0  ;;  %v1249_v4 = vld [vmem:[%s1743_s0 + $0x70] sm:$0xff]   ;;  %v1252_v7 = vld [vmem:[%s1743_s0 + $0x68] sm:$0xff]   ;;  %vm1326_vm3 = vmmov 0   ;;  %vm981_vm4 = vcmask 1041408   ;;  %vm977_vm5 = vcmask 687104  }
   0x2   :  { %v1247_v2 = vld [vmem:[%s1743_s0 + $0xb8] sm:$0xff]   ;;  %1244 = vset.pattern.permute.xlu0 %v1324_v0  ;;  %1111 = vmatprep.subr.bf16.mxu0 %v1246_v1  ;;  %v1250_v5 = vld [vmem:[%s1743_s0 + $0xb0] sm:$0xff]   ;;  %v1253_v8 = vld [vmem:[%s1743_s0 + $0xa8] sm:$0xff]  }
   0x3   :  { %v1248_v3 = vld [vmem:[%s1743_s0 + $0x38] sm:$0xff]   ;;  %615 = vmatpush1.bf16.msra.mxu1 %v1247_v2  ;;  %v1251_v6 = vld [vmem:[%s1743_s0 + $0x30] sm:$0xff]   ;;  %v1254_v9 = vld [vmem:[%s1743_s0 + $0x28] sm:$0xff]  }
   0x4   :  { %1112 = vmatpush3.bf16.msra.mxu0 %v1248_v3  ;;  %616 = vmatprep.subr.bf16.mxu1 %v1324_v0  ;;  %v1255_v10 = vld [vmem:[%s1743_s0 + $0x60] sm:$0xff]   ;;  %v1258_v13 = vld [vmem:[%s1743_s0 + $0x58] sm:$0xff]   ;;  %v1261_v16 = vld [vmem:[%s1743_s0 + $0x50] sm:$0xff]  }
   0x5   :  { %1113 = vmatprep.subr.bf16.mxu0 %v1249_v4  ;;  %v1256_v11 = vld [vmem:[%s1743_s0 + $0xa0] sm:$0xff]   ;;  %v1259_v14 = vld [vmem:[%s1743_s0 + $0x98] sm:$0xff]   ;;  %v1262_v17 = vld [vmem:[%s1743_s0 + $0x90] sm:$0xff]  }
   0x6   :  { %v1257_v12 = vld [vmem:[%s1743_s0 + $0x20] sm:$0xff]   ;;  %v1260_v15 = vld [vmem:[%s1743_s0 + $0x18] sm:$0xff]   ;;  %v1263_v18 = vld [vmem:[%s1743_s0 + $0x10] sm:$0xff]  }
   0x7   :  { %617 = vmatpush1.bf16.msra.mxu1 %v1250_v5  ;;  %v1264_v19 = vld [vmem:[%s1743_s0 + $0x48] sm:$0xff]   ;;  %v1267_v22 = vld [vmem:[%s1743_s0 + $0x40] sm:$0xff]   ;;  %v121_v35 = vld [vmem:[%s1745_s2 + $0x70] sm:$0xff] }
   0x8   :  { %1114 = vmatpush3.bf16.msra.mxu0 %v1251_v6  ;;  %618 = vmatprep.subr.bf16.mxu1 %v1324_v0  ;;  %v1265_v20 = vld [vmem:[%s1743_s0 + $0x88] sm:$0xff]   ;;  %v1272_v23 = vld [vmem:[%s1744_s1 + $0x4] ss:$16 sps:$4 sm:$0xff]   ;;  %v1270_v27 = vld [vmem:[%s1744_s1] ss:$16 sps:$4 sm:$0xff]  }
   0x9   :  { %1115 = vmatprep.subr.bf16.mxu0 %v1252_v7  ;;  %v1266_v21 = vld [vmem:[%s1743_s0 + $0x8] sm:$0xff]   ;;  %v1268_v24 = vld [vmem:[%s1743_s0 + $0x80] sm:$0xff]   ;;  %550 = vmatprep.mubr.bf16.mxu0 %v1272_v23  ;;  %v117_v39 = vld [vmem:[%s1745_s2 + $0x50] sm:$0xff] }
   0xa   :  { %v1276_v25 = vld [vmem:[%s1744_s1 + $0xc] ss:$16 sps:$4 sm:$0xff]   ;;  %v1269_v26 = vld [vmem:[%s1743_s0] sm:$0xff]   ;;  %v1274_v30 = vld [vmem:[%s1744_s1 + $0x8] ss:$16 sps:$4 sm:$0xff]   ;;  %194 = vperm.xlu0 %1244, %v121_v35  }
   0xb   :  { %619 = vmatpush1.bf16.msra.mxu1 %v1253_v8  ;;  %1089 = vmatprep.mubr.msk.bf16.mxu1 %vm493_vm0, %v1276_v25  ;;  %v1273_v28 = vld [vmem:[%s1743_s0 + $0xc0] sm:$0xff]   ;;  %v1280_v31 = vld [vmem:[%s1744_s1 + $0x2c] ss:$16 sps:$4 sm:$0xff]   ;;  %v1282_v34 = vld [vmem:[%s1744_s1 + $0x28] ss:$16 sps:$4 sm:$0xff]  }
   0xc   :  { %1116 = vmatpush3.bf16.msra.mxu0 %v1254_v9  ;;  %620 = vmatprep.subr.bf16.mxu1 %v1324_v0  ;;  %v1277_v29 = vld [vmem:[%s1744_s1 + $0x24] ss:$16 sps:$4 sm:$0xff]   ;;  %v1279_v32 = vld [vmem:[%s1744_s1 + $0x20] ss:$16 sps:$4 sm:$0xff]   ;;  %v120_v36 = vld [vmem:[%s1745_s2 + $0x68] sm:$0xff] }
   0xd   :  { %1117 = vmatprep.subr.bf16.mxu0 %v1255_v10  ;;  %v1283_v33 = vld [vmem:[%s1744_s1 + $0x44] ss:$16 sps:$4 sm:$0xff]   ;;  %v1286_v37 = vld [vmem:[%s1744_s1 + $0x4c] ss:$16 sps:$4 sm:$0xff]   ;;  %189 = vperm.xlu1 %1245, %v120_v36   ;;  %v1285_v40 = vld [vmem:[%s1744_s1 + $0x40] ss:$16 sps:$4 sm:$0xff]  }
   0xe   :  { %v119_v38 = vld [vmem:[%s1745_s2 + $0x60] sm:$0xff]  ;;  %v118_v42 = vld [vmem:[%s1745_s2 + $0x58] sm:$0xff]  ;;  %v116_v46 = vld [vmem:[%s1745_s2 + $0x48] sm:$0xff] }
   0xf   :  { %621 = vmatpush1.bf16.msra.mxu1 %v1256_v11  ;;  %184 = vperm.xlu0 %1244, %v119_v38   ;;  %v1289_v41 = vld [vmem:[%s1744_s1 + $0x64] ss:$16 sps:$4 sm:$0xff]   ;;  %v1288_v44 = vld [vmem:[%s1744_s1 + $0x48] ss:$16 sps:$4 sm:$0xff]   ;;  %v1292_v45 = vld [vmem:[%s1744_s1 + $0x6c] ss:$16 sps:$4 sm:$0xff]  }
  0x10   :  { %1118 = vmatpush3.bf16.msra.mxu0 %v1257_v12  ;;  %622 = vmatprep.subr.bf16.mxu1 %v1324_v0  ;;  %v115_v43 = vld [vmem:[%s1745_s2 + $0x40] sm:$0xff]  ;;  %v113_v47 = vld [vmem:[%s1745_s2 + $0x30] sm:$0xff]  ;;  %v114_v50 = vld [vmem:[%s1745_s2 + $0x38] sm:$0xff] }
  0x11   :  { %1119 = vmatprep.subr.bf16.mxu0 %v1258_v13  ;;  %174 = vperm.xlu1 %1245, %v117_v39   ;;  %v1291_v48 = vld [vmem:[%s1744_s1 + $0x60] ss:$16 sps:$4 sm:$0xff]   ;;  %v1295_v49 = vld [vmem:[%s1744_s1 + $0x84] ss:$16 sps:$4 sm:$0xff]   ;;  %v1294_v52 = vld [vmem:[%s1744_s1 + $0x68] ss:$16 sps:$4 sm:$0xff]  }
  0x12   :  { %v111_v51 = vld [vmem:[%s1745_s2 + $0x20] sm:$0xff]  ;;  %v1298_v53 = vld [vmem:[%s1744_s1 + $0x8c] ss:$16 sps:$4 sm:$0xff]   ;;  %v109_v55 = vld [vmem:[%s1745_s2 + $0x10] sm:$0xff] }
  0x13   :  { %623 = vmatpush1.bf16.msra.mxu1 %v1259_v14  ;;  %179 = vperm.xlu0 %1244, %v118_v42   ;;  %v112_v54 = vld [vmem:[%s1745_s2 + $0x28] sm:$0xff]  ;;  %v1297_v56 = vld [vmem:[%s1744_s1 + $0x80] ss:$16 sps:$4 sm:$0xff]   ;;  %v1301_v57 = vld [vmem:[%s1744_s1 + $0xa4] ss:$16 sps:$4 sm:$0xff]  }
  0x14   :  { %1120 = vmatpush3.bf16.msra.mxu0 %v1260_v15  ;;  %624 = vmatprep.subr.bf16.mxu1 %v1324_v0  ;;  %v110_v58 = vld [vmem:[%s1745_s2 + $0x18] sm:$0xff]  ;;  %v107_v59 = vld [vmem:[%s1745_s2] sm:$0xff]  ;;  %v108_v62 = vld [vmem:[%s1745_s2 + $0x8] sm:$0xff] }
  0x15   :  { %1121 = vmatprep.subr.bf16.mxu0 %v1261_v16  ;;  %164 = vperm.xlu1 %1245, %v115_v43   ;;  %v1300_v60 = vld [vmem:[%s1744_s1 + $0x88] ss:$16 sps:$4 sm:$0xff]   ;;  %v1304_v61 = vld [vmem:[%s1744_s1 + $0xac] ss:$16 sps:$4 sm:$0xff]   ;;  %v754_v63 = vld [vmem:[%s1746_s4 + $0x50] sm:$0xf] }
  0x16   :  { %v1307_v1 = vld [vmem:[%s1744_s1 + $0xc4] ss:$16 sps:$4 sm:$0xff]   ;;  %v753_v3 = vld [vmem:[%s1746_s4 + $0x48] sm:$0xff]  ;;  %v751_v8 = vld [vmem:[%s1746_s4 + $0x38] sm:$0xff] }
  0x17   :  { %625 = vmatpush1.bf16.msra.mxu1 %v1262_v17  ;;  %169 = vperm.xlu0 %1244, %v116_v46   ;;  %v752_v2 = vld [vmem:[%s1746_s4 + $0x40] sm:$0xff]  ;;  %v1306_v4 = vld [vmem:[%s1744_s1 + $0xa8] ss:$16 sps:$4 sm:$0xff]   ;;  %v1310_v5 = vld [vmem:[%s1744_s1 + $0xcc] ss:$16 sps:$4 sm:$0xff]  }
  0x18   :  { %1122 = vmatpush3.bf16.msra.mxu0 %v1263_v18  ;;  %626 = vmatprep.subr.bf16.mxu1 %v1324_v0  ;;  %v750_v6 = vld [vmem:[%s1746_s4 + $0x30] sm:$0xff]  ;;  %v55_v7 = vld [vmem:[%s1744_s1 + $0xe0] sm:$0xff]  ;;  %v56_v11 = vld [vmem:[%s1744_s1 + $0xe8] sm:$0xff] }
  0x19   :  { %1123 = vmatprep.subr.bf16.mxu0 %v1264_v19  ;;  %154 = vperm.xlu1 %1245, %v113_v47   ;;  %v1309_v9 = vld [vmem:[%s1744_s1 + $0xc0] ss:$16 sps:$4 sm:$0xff]   ;;  %v1061_v10 = vcombine.high %v55_v7, %v55_v7  ;;  %v749_v13 = vld [vmem:[%s1746_s4 + $0x28] sm:$0xff]  ;;  %v1063_v15 = vcombine.high %v56_v11, %v56_v11  ;;  %v747_v17 = vld [vmem:[%s1746_s4 + $0x18] sm:$0xff]  ;;  %v1060_v18 = vcombine.low %v55_v7, %v55_v7 }
  0x1a   :  { %v748_v12 = vld [vmem:[%s1746_s4 + $0x20] sm:$0xff]  ;;  %v1312_v14 = vld [vmem:[%s1744_s1 + $0xc8] ss:$16 sps:$4 sm:$0xff]   ;;  %v746_v16 = vld [vmem:[%s1746_s4 + $0x10] sm:$0xff] }
  0x1b   :  { %627 = vmatpush1.bf16.msra.mxu1 %v1265_v20  ;;  %159 = vperm.xlu0 %1244, %v114_v50   ;;  %v744_v19 = vld [vmem:[%s1746_s4] sm:$0xff]  ;;  %v745_v20 = vld [vmem:[%s1746_s4 + $0x8] sm:$0xff] }
  0x1c   :  { %1124 = vmatpush3.bf16.msra.mxu0 %v1266_v21  ;;  %628 = vmatprep.subr.bf16.mxu1 %v1324_v0  ;;  %v1062_v21 = vcombine.low %v56_v11, %v56_v11  ;;  %v961_v23 = vld [vmem:[%s1747_s6 + $0x8] sm:$0x3] }
  0x1d   :  { %1125 = vmatprep.subr.bf16.mxu0 %v1267_v22  ;;  %144 = vperm.xlu1 %1245, %v111_v51   ;;  %v960_v22 = vld [vmem:[%s1747_s6] sm:$0xff] }
  0x1f   :  { %629 = vmatpush1.bf16.msra.mxu1 %v1268_v24  ;;  %149 = vperm.xlu0 %1244, %v112_v54  }
  0x20   :  { %1126 = vmatpush3.bf16.msra.mxu0 %v1269_v26  ;;  %644 = vmatprep.subr.bf16.mxu1 %v1324_v0  ;;  %v1303_v0 = vld [vmem:[%s1744_s1 + $0xa0] ss:$16 sps:$4 sm:$0xff]  }
  0x21   :  { %134 = vperm.xlu1 %1245, %v109_v55  }
  0x23   :  { %551 = vmatmul.mubr.bf16.vlgmr.msra.gmra.mxu0 %v1270_v27  ;;  %645 = vmatpush2.bf16.msra.mxu1 %v1273_v28  ;;  %v1317_v27 = vld [vmem:[%s1748_s3] sm:$0xff]  }
  0x24   :  { %558 = vmatprep.mubr.bf16.mxu0 %v1277_v29  ;;  %139 = vperm.xlu0 %1244, %v110_v58  }
  0x25   :  { %124 = vperm.xlu1 %1245, %v107_v59  }
  0x26   :  { %647 = vmatmul.mubr.bf16.vlgmr.msra.gmra.mxu1 %v1274_v30 }
  0x27   :  { %1090 = vmatprep.mubr.msk.bf16.mxu1 %vm493_vm0, %v1280_v31 }
  0x28   :  { %129 = vperm.xlu0 %1244, %v108_v62  }
  0x29   :  { %807 = vperm.xlu1 %1245, %v754_v63  }
  0x2b   :  { %559 = vmatmul.mubr.bf16.gmra.mxu0 %v1279_v32 }
  0x2c   :  { %566 = vmatprep.mubr.bf16.mxu0 %v1283_v33  ;;  %797 = vperm.xlu0 %1244, %v752_v2  }
  0x2d   :  { %802 = vperm.xlu1 %1245, %v753_v3  }
  0x2e   :  { %655 = vmatmul.mubr.bf16.gmra.mxu1 %v1282_v34 }
  0x2f   :  { %1091 = vmatprep.mubr.msk.bf16.mxu1 %vm493_vm0, %v1286_v37 }
  0x30   :  { %787 = vperm.xlu0 %1244, %v750_v6  }
  0x31   :  { %792 = vperm.xlu1 %1245, %v751_v8  }
  0x33   :  { %567 = vmatmul.mubr.bf16.gmra.mxu0 %v1285_v40 }
  0x34   :  { %574 = vmatprep.mubr.bf16.mxu0 %v1289_v41  ;;  %777 = vperm.xlu0 %1244, %v748_v12  }
  0x35   :  { %782 = vperm.xlu1 %1245, %v749_v13  }
  0x36   :  { %663 = vmatmul.mubr.bf16.gmra.mxu1 %v1288_v44 }
  0x37   :  { %1092 = vmatprep.mubr.msk.bf16.mxu1 %vm493_vm0, %v1292_v45 }
  0x38   :  { %767 = vperm.xlu0 %1244, %v746_v16  }
  0x39   :  { %772 = vperm.xlu1 %1245, %v747_v17  }
  0x3b   :  { %575 = vmatmul.mubr.bf16.gmra.mxu0 %v1291_v48 }
  0x3c   :  { %582 = vmatprep.mubr.bf16.mxu0 %v1295_v49  ;;  %757 = vperm.xlu0 %1244, %v744_v19  }
  0x3d   :  { %762 = vperm.xlu1 %1245, %v745_v20  }
  0x3e   :  { %671 = vmatmul.mubr.bf16.gmra.mxu1 %v1294_v52 }
  0x3f   :  { %1093 = vmatprep.mubr.msk.bf16.mxu1 %vm493_vm0, %v1298_v53 }
  0x40   :  { %964 = vperm.xlu0 %1244, %v960_v22  }
  0x41   :  { %969 = vperm.xlu1 %1245, %v961_v23  }
  0x43   :  { %583 = vmatmul.mubr.bf16.gmra.mxu0 %v1297_v56 }
  0x44   :  { %590 = vmatprep.mubr.bf16.mxu0 %v1301_v57 }
  0x46   :  { %679 = vmatmul.mubr.bf16.gmra.mxu1 %v1300_v60 }
  0x47   :  { %1094 = vmatprep.mubr.msk.bf16.mxu1 %vm493_vm0, %v1304_v61 }
  0x4b   :  { %591 = vmatmul.mubr.bf16.gmra.mxu0 %v1303_v0 }
  0x4c   :  { %598 = vmatprep.mubr.bf16.mxu0 %v1307_v1 }
  0x4e   :  { %687 = vmatmul.mubr.bf16.gmra.mxu1 %v1306_v4 }
  0x4f   :  { %1095 = vmatprep.mubr.msk.bf16.mxu1 %vm493_vm0, %v1310_v5 }
  0x53   :  { %599 = vmatmul.mubr.bf16.gmra.mxu0 %v1309_v9 }
  0x54   :  { %606 = vmatprep.mubr.bf16.mxu0 %v1061_v10 }
  0x56   :  { %695 = vmatmul.mubr.bf16.gmra.mxu1 %v1312_v14 }
  0x57   :  { %1096 = vmatprep.mubr.msk.bf16.mxu1 %vm493_vm0, %v1063_v15 }
  0x5b   :  { %607 = vmatmul.mubr.bf16.gmra.mxu0 %v1060_v18 }
  0x5c   :  { %1212 = vmatprep.mubr.msk.bf16.mxu0 %vm838_vm1, %v1317_v27 }
  0x5e   :  { %703 = vmatmul.mubr.bf16.gmra.mxu1 %v1062_v21 }
  0x85   :  { %v1635_v24 = vpop.permute.xlu0 %194 }
  0x88   :  { %v1637_v25 = vpop.permute.xlu1 %189 }
  0x8a   :  { %v1639_v26 = vpop.permute.xlu0 %184 }
  0x8c   :  { %v1644_v28 = vpop.permute.xlu1 %174 }
  0x8e   :  { %v1647_v29 = vpop.permute.xlu0 %179 }
  0x90   :  { %v1649_v30 = vpop.permute.xlu1 %164 }
  0x92   :  { %v1651_v31 = vpop.permute.xlu0 %169 }
  0x94   :  { %v1653_v32 = vpop.permute.xlu1 %154 }
  0x96   :  { %v1655_v33 = vpop.permute.xlu0 %159 }
  0x98   :  { %v1657_v34 = vpop.permute.xlu1 %144 }
  0x9a   :  { %v1659_v35 = vpop.permute.xlu0 %149 }
  0x9c   :  { %v135_v36 = vpop.permute.xlu1 %134 }
  0x9f   :  { %v140_v38 = vpop.permute.xlu0 %139 }
  0xa0   :  { %v125_v40 = vpop.permute.xlu1 %124 }
  0xa3   :  { %v130_v47 = vpop.permute.xlu0 %129 }
  0xe3   :  { %v1127_v37 = vpop.f32.mrf.mxu0 }
  0xe5   :  { %v1128_v39 = vpop.f32.mrf.mxu0 }
  0xe6   :  { %v1129_v41 = vadd.f32 %v1128_v39, %v1127_v37  ;;  %v648_v42 = vpop.f32.mrf.mxu1 }
  0xe7   :  { %v1130_v43 = vpop.f32.mrf.mxu0 }
  0xe8   :  { %v553_v44 = vadd.f32 %v1129_v41, %v125_v40  ;;  %v650_v45 = vpop.f32.mrf.mxu1 }
  0xe9   :  { %v1131_v46 = vpop.f32.mrf.mxu0 }
  0xea   :  { %v649_v48 = vadd.f32 %v648_v42, %v553_v44  ;;  %v1132_v49 = vadd.f32 %v1131_v46, %v1130_v43  ;;  %v651_v50 = vpop.f32.mrf.mxu1 }
  0xeb   :  { %v1133_v51 = vpop.f32.mrf.mxu0 }
  0xec   :  { %v556_v52 = vadd.f32 %v1132_v49, %v130_v47  ;;  %v653_v53 = vpop.f32.mrf.mxu1  ;;  %v710_v59 = vmax.f32 %v649_v48, 0.0 }
  0xed   :  { %v1134_v54 = vpop.f32.mrf.mxu0 }
  0xee   :  { %v652_v55 = vadd.f32 %v651_v50, %v556_v52  ;;  %v1135_v56 = vadd.f32 %v1134_v54, %v1133_v51  ;;  %v656_v57 = vpop.f32.mrf.mxu1 }
  0xef   :  { %v1136_v58 = vpop.f32.mrf.mxu0 }
  0xf0   :  { %v711_v60 = vmax.f32 %v652_v55, 0.0  ;;  %v561_v61 = vadd.f32 %v1135_v56, %v135_v36  ;;  %v658_v62 = vpop.f32.mrf.mxu1 }
  0xf1   :  { %v1137_v63 = vpop.f32.mrf.mxu0 }
  0xf2   :  { %v657_v0 = vadd.f32 %v656_v57, %v561_v61  ;;  %v1138_v1 = vadd.f32 %v1137_v63, %v1136_v58  ;;  %v659_v2 = vpop.f32.mrf.mxu1  ;;  %v1661_v3 = vpack.c.bf16 %v711_v60, %v710_v59 }
  0xf3   :  { %v1663_v4 = vpop.f32.mrf.mxu0 }
  0xf4   :  { %v564_v5 = vadd.f32 %v1138_v1, %v140_v38  ;;  %v661_v6 = vpop.f32.mrf.mxu1  ;;  %v712_v11 = vmax.f32 %v657_v0, 0.0 }
  0xf5   :  { %v1665_v7 = vpop.f32.mrf.mxu0 }
  0xf6   :  { %v660_v8 = vadd.f32 %v659_v2, %v564_v5  ;;  %v1667_v9 = vpop.f32.mrf.mxu1 }
  0xf7   :  { %v1669_v10 = vpop.f32.mrf.mxu0 }
  0xf8   :  { %v713_v12 = vmax.f32 %v660_v8, 0.0  ;;  %v666_v13 = vpop.f32.mrf.mxu1 }
  0xf9   :  { %v1671_v14 = vpop.f32.mrf.mxu0 }
  0xfa   :  { %v1673_v15 = vpack.c.bf16 %v713_v12, %v712_v11  ;;  %v1675_v16 = vpop.f32.mrf.mxu1 }
  0xfb   :  { %v1145_v17 = vpop.f32.mrf.mxu0 }
  0xfc   :  { %v669_v18 = vpop.f32.mrf.mxu1 }
  0xfd   :  { %v1146_v19 = vpop.f32.mrf.mxu0 }
  0xfe   :  { %v1677_v20 = vpop.f32.mrf.mxu1 }
  0xff   :  { %v1148_v21 = vpop.f32.mrf.mxu0 }
 0x100   :  { %v674_v22 = vpop.f32.mrf.mxu1 }
 0x101   :  { %v1149_v23 = vpop.f32.mrf.mxu0 }
 0x102   :  { %v1679_v27 = vpop.f32.mrf.mxu1 }
 0x103   :  { %v1151_v36 = vpop.f32.mrf.mxu0 }
 0x104   :  { %v677_v37 = vpop.f32.mrf.mxu1 }
 0x105   :  { %v1152_v38 = vpop.f32.mrf.mxu0 }
 0x106   :  { %v1681_v39 = vpop.f32.mrf.mxu1 }
 0x107   :  { %v1154_v40 = vpop.f32.mrf.mxu0 }
 0x108   :  { %v682_v41 = vpop.f32.mrf.mxu1 }
 0x109   :  { %v1155_v42 = vpop.f32.mrf.mxu0 }
 0x10a   :  { %v683_v43 = vpop.f32.mrf.mxu1  ;;  %v1156_v13 = vadd.f32 %v1155_v42, %v1154_v40  ;;  %v1147_v42 = vadd.f32 %v1146_v19, %v1145_v17  ;;  %v1141_v17 = vadd.f32 %v1665_v7, %v1663_v4 }
 0x10b   :  { %v1157_v44 = vpop.f32.mrf.mxu0 }
 0x10c   :  { %v685_v45 = vpop.f32.mrf.mxu1  ;;  %v577_v19 = vadd.f32 %v1147_v42, %v1653_v32 }
 0x10d   :  { %v1158_v46 = vpop.f32.mrf.mxu0 }
 0x10e   :  { %v688_v47 = vpop.f32.mrf.mxu1  ;;  %v1159_v5 = vadd.f32 %v1158_v46, %v1157_v44  ;;  %v1150_v44 = vadd.f32 %v1149_v23, %v1148_v21 }
 0x10f   :  { %v1160_v48 = vpop.f32.mrf.mxu0 }
 0x110   :  { %v690_v49 = vpop.f32.mrf.mxu1 }
 0x111   :  { %v1161_v50 = vpop.f32.mrf.mxu0  ;;  %v1153_v49 = vadd.f32 %v1152_v38, %v1151_v36  ;;  %v580_v36 = vadd.f32 %v1150_v44, %v1655_v33 }
 0x112   :  { %v691_v51 = vpop.f32.mrf.mxu1  ;;  %v1162_v63 = vadd.f32 %v1161_v50, %v1160_v48  ;;  %v593_v48 = vadd.f32 %v1159_v5, %v1644_v28  ;;  %v1144_v28 = vadd.f32 %v1671_v14, %v1669_v10 }
 0x113   :  { %v1163_v52 = vpop.f32.mrf.mxu0  ;;  %v676_v10 = vadd.f32 %v1679_v27, %v580_v36 }
 0x114   :  { %v693_v53 = vpop.f32.mrf.mxu1  ;;  %v596_v18 = vadd.f32 %v1162_v63, %v1647_v29  ;;  %v585_v29 = vadd.f32 %v1153_v49, %v1649_v30 }
 0x115   :  { %v1164_v54 = vpop.f32.mrf.mxu0  ;;  %v717_v32 = vmax.f32 %v676_v10, 0.0 }
 0x116   :  { %v696_v55 = vpop.f32.mrf.mxu1  ;;  %v1165_v59 = vadd.f32 %v1164_v54, %v1163_v52  ;;  %v692_v46 = vadd.f32 %v691_v51, %v596_v18  ;;  %v681_v30 = vadd.f32 %v1681_v39, %v585_v29  ;;  %v572_v51 = vadd.f32 %v1144_v28, %v1659_v35 }
 0x117   :  { %v1166_v56 = vpop.f32.mrf.mxu0 }
 0x118   :  { %v698_v57 = vpop.f32.mrf.mxu1  ;;  %v601_v6 = vadd.f32 %v1165_v59, %v1639_v26  ;;  %v588_v26 = vadd.f32 %v1156_v13, %v1651_v31  ;;  %v721_v21 = vmax.f32 %v692_v46, 0.0  ;;  %v668_v4 = vadd.f32 %v1675_v16, %v572_v51  ;;  %v1321_v16 = vld [vmem:[%s1748_s3 + $0x20] sm:$0xff]  }
 0x119   :  { %v1167_v58 = vpop.f32.mrf.mxu0 }
 0x11a   :  { %v1168_v60 = vadd.f32 %v1167_v58, %v1166_v56  ;;  %v699_v61 = vpop.f32.mrf.mxu1  ;;  %v684_v38 = vadd.f32 %v683_v43, %v588_v26  ;;  %v569_v43 = vadd.f32 %v1141_v17, %v1657_v34  ;;  %v718_v58 = vmax.f32 %v681_v30, 0.0  ;;  %v1318_v34 = vld [vmem:[%s1748_s3 + $0x8] sm:$0xff]  }
 0x11b   :  { %v1169_v62 = vpop.f32.mrf.mxu0  ;;  %v715_v35 = vmax.f32 %v668_v4, 0.0 }
 0x11c   :  { %v604_v0 = vadd.f32 %v1168_v60, %v1637_v25  ;;  %v701_v1 = vpop.f32.mrf.mxu1  ;;  %v697_v25 = vadd.f32 %v696_v55, %v601_v6  ;;  %v719_v33 = vmax.f32 %v684_v38, 0.0  ;;  %v673_v55 = vadd.f32 %v1677_v20, %v577_v19 }
 0x11d   :  { %v1170_v2 = vpop.f32.mrf.mxu0  ;;  %v665_v39 = vadd.f32 %v1667_v9, %v569_v43  ;;  %v1319_v9 = vld [vmem:[%s1748_s3 + $0x10] sm:$0xff]   ;;  %v1325_v20 = vmov 0.0  }
 0x11e   :  { %v1171_v8 = vadd.f32 %v1170_v2, %v1169_v62  ;;  %v704_v11 = vpop.f32.mrf.mxu1  ;;  %v700_v22 = vadd.f32 %v699_v61, %v604_v0  ;;  %v722_v56 = vmax.f32 %v697_v25, 0.0  ;;  %v729_v7 = vpack.c.bf16 %v719_v33, %v718_v58  ;;  %1224 = vmatprep.subr.bf16.mxu1 %v1325_v20  ;;  %1236 = vmatprep.mubr.msk.bf16.mxu1 %vm1326_vm3, %v1325_v20  ;;  %v808_v0 = vpop.permute.xlu1 %807 }
 0x11f   :  { %v1172_v12 = vpop.f32.mrf.mxu0  ;;  %v716_v59 = vmax.f32 %v673_v55, 0.0  ;;  %v714_v60 = vmax.f32 %v665_v39, 0.0  ;;  %v1323_v39 = vld [vmem:[%s1749_s5] sm:$0x1f]  }
 0x120   :  { %v609_v37 = vadd.f32 %v1171_v8, %v1635_v24  ;;  %v706_v41 = vpop.f32.mrf.mxu1  ;;  %v723_v53 = vmax.f32 %v700_v22, 0.0  ;;  %v689_v24 = vadd.f32 %v688_v47, %v593_v48 }
 0x121   :  { %v1173_v45 = vpop.f32.mrf.mxu0  ;;  %v728_v27 = vpack.c.bf16 %v717_v32, %v716_v59  ;;  %v727_v61 = vpack.c.bf16 %v715_v35, %v714_v60 }
 0x122   :  { %v705_v50 = vadd.f32 %v704_v11, %v609_v37  ;;  %v707_v52 = vpop.f32.mrf.mxu1  ;;  %v731_v23 = vpack.c.bf16 %v723_v53, %v722_v56  ;;  %v720_v47 = vmax.f32 %v689_v24, 0.0  ;;  %v803_v6 = vpop.permute.xlu1 %802 }
 0x123   :  { %v798_v11 = vpop.permute.xlu0 %797 }
 0x124   :  { %v724_v54 = vmax.f32 %v705_v50, 0.0  ;;  %v708_v40 = vpop.f32.mrf.mxu1  ;;  %v730_v14 = vpack.c.bf16 %v721_v21, %v720_v47 }
 0x126   :  { %v732_v57 = vpack.c.bf16 %v724_v54, %v724_v54  ;;  %v793_v18 = vpop.permute.xlu1 %792 }
 0x127   :  { %v788_v41 = vpop.permute.xlu0 %787 }
 0x128   :  { %1240 = vmatprep.subr.msk.bf16.mxu0 %vm857_vm2, %v732_v57  ;;  %v859_v31 = vsel %vm857_vm2, %v732_v57, 0 }
 0x129   :  { %1197 = vmatpush3.bf16.msra.mxu0 %v859_v31 }
 0x12a   :  { %1198 = vmatprep.subr.bf16.mxu0 %v731_v23  ;;  %v783_v52 = vpop.permute.xlu1 %782 }
 0x12b   :  { %v778_v54 = vpop.permute.xlu0 %777 }
 0x12d   :  { %1199 = vmatpush3.bf16.msra.mxu0 %v731_v23 }
 0x12e   :  { %1200 = vmatprep.subr.bf16.mxu0 %v730_v14  ;;  %v773_v28 = vpop.permute.xlu1 %772 }
 0x12f   :  { %v768_v21 = vpop.permute.xlu0 %767 }
 0x131   :  { %1201 = vmatpush3.bf16.msra.mxu0 %v730_v14 }
 0x132   :  { %1202 = vmatprep.subr.bf16.mxu0 %v729_v7  ;;  %v763_v47 = vpop.permute.xlu1 %762 }
 0x133   :  { %v758_v14 = vpop.permute.xlu0 %757 }
 0x135   :  { %1203 = vmatpush3.bf16.msra.mxu0 %v729_v7 }
 0x136   :  { %1204 = vmatprep.subr.bf16.mxu0 %v728_v27 }
 0x137   :  { %v965_v59 = vpop.permute.xlu0 %964 }
 0x139   :  { %1205 = vmatpush3.bf16.msra.mxu0 %v728_v27 }
 0x13a   :  { %1206 = vmatprep.subr.bf16.mxu0 %v727_v61 }
 0x13d   :  { %1207 = vmatpush3.bf16.msra.mxu0 %v727_v61  ;;  %v970_v61 = vpop.permute.xlu1 %969 }
 0x13e   :  { %1208 = vmatprep.subr.bf16.mxu0 %v1673_v15 }
 0x141   :  { %1209 = vmatpush3.bf16.msra.mxu0 %v1673_v15  ;;  %v1320_v15 = vld [vmem:[%s1748_s3 + $0x18] sm:$0xff]  }
 0x142   :  { %1210 = vmatprep.subr.bf16.mxu0 %v1661_v3 }
 0x145   :  { %1211 = vmatpush3.bf16.msra.mxu0 %v1661_v3  ;;  %v1322_v3 = vld [vmem:[%s1748_s3 + $0x28] ss:$0 sps:$4 sm:$0x33]  }
 0x148   :  { %1213 = vmatmul.mubr.msk.bf16.vlgmr.msra.gmra.mxu0 %vm838_vm1, %v1318_v34 }
 0x149   :  { %1216 = vmatprep.mubr.msk.bf16.mxu0 %vm838_vm1, %v1319_v9 }
 0x150   :  { %1217 = vmatmul.mubr.msk.bf16.gmra.mxu0 %vm838_vm1, %v1320_v15 }
 0x151   :  { %1220 = vmatprep.mubr.msk.bf16.mxu0 %vm838_vm1, %v1321_v16 }
 0x158   :  { %1221 = vmatmul.mubr.msk.bf16.gmra.mxu0 %vm838_vm1, %v1322_v3 }
 0x208   :  { %v1214_v62 = vpop.f32.mrf.mxu0 }
 0x209   :  { %v904_v19 = vadd.f32 %v1214_v62, %v768_v21 }
 0x20a   :  { %v895_v63 = vpop.f32.mrf.mxu0 }
 0x20b   :  { %v943_v43 = vmax.f32 %v904_v19, 0.0  ;;  %v896_v55 = vadd.f32 %v895_v63, %v758_v14 }
 0x20c   :  { %v1215_v1 = vpop.f32.mrf.mxu0 }
 0x20d   :  { %v907_v23 = vadd.f32 %v1215_v1, %v773_v28  ;;  %v941_v32 = vmax.f32 %v896_v55, 0.0 }
 0x20e   :  { %v898_v2 = vpop.f32.mrf.mxu0 }
 0x20f   :  { %v944_v51 = vmax.f32 %v907_v23, 0.0  ;;  %v899_v10 = vadd.f32 %v898_v2, %v763_v47 }
 0x210   :  { %v1218_v5 = vpop.f32.mrf.mxu0 }
 0x211   :  { %v920_v40 = vadd.f32 %v1218_v5, %v788_v41  ;;  %v953_v58 = vpack.c.bf16 %v944_v51, %v943_v43  ;;  %v942_v4 = vmax.f32 %v899_v10, 0.0 }
 0x212   :  { %v911_v8 = vpop.f32.mrf.mxu0 }
 0x213   :  { %v947_v36 = vmax.f32 %v920_v40, 0.0  ;;  %v912_v38 = vadd.f32 %v911_v8, %v778_v54  ;;  %v952_v7 = vpack.c.bf16 %v942_v4, %v941_v32 }
 0x214   :  { %v1219_v12 = vpop.f32.mrf.mxu0 }
 0x215   :  { %v923_v26 = vadd.f32 %v1219_v12, %v793_v18  ;;  %v945_v30 = vmax.f32 %v912_v38, 0.0 }
 0x216   :  { %v914_v13 = vpop.f32.mrf.mxu0 }
 0x217   :  { %v948_v24 = vmax.f32 %v923_v26, 0.0  ;;  %v915_v56 = vadd.f32 %v914_v13, %v783_v52 }
 0x218   :  { %v1222_v22 = vpop.f32.mrf.mxu0 }
 0x219   :  { %v936_v37 = vadd.f32 %v1222_v22, %v808_v0  ;;  %v955_v31 = vpack.c.bf16 %v948_v24, %v947_v36  ;;  %v946_v17 = vmax.f32 %v915_v56, 0.0 }
 0x21a   :  { %v927_v45 = vpop.f32.mrf.mxu0 }
 0x21b   :  { %v951_v49 = vmax.f32 %v936_v37, 0.0  ;;  %v928_v50 = vadd.f32 %v927_v45, %v798_v11  ;;  %v954_v33 = vpack.c.bf16 %v946_v17, %v945_v30 }
 0x21c   :  { %v1223_v48 = vpop.f32.mrf.mxu0 }
 0x21d   :  { %v957_v25 = vpack.c.bf16 %v951_v49, %v951_v49  ;;  %v949_v42 = vmax.f32 %v928_v50, 0.0 }
 0x21e   :  { %v930_v44 = vpop.f32.mrf.mxu0 }
 0x21f   :  { %v931_v46 = vadd.f32 %v930_v44, %v803_v6  ;;  %v983_v53 = vsel %vm981_vm4, %v957_v25, 0 }
 0x220   :  { %1225 = vmatpush3.bf16.msra.mxu1 %v983_v53 }
 0x221   :  { %v950_v29 = vmax.f32 %v931_v46, 0.0  ;;  %1226 = vmatprep.subr.bf16.mxu1 %v1325_v20 }
 0x223   :  { %v956_v57 = vpack.c.bf16 %v950_v29, %v949_v42 }
 0x225   :  { %1227 = vmatpush3.bf16.msra.mxu1 %v956_v57 }
 0x226   :  { %1228 = vmatprep.subr.bf16.mxu1 %v1325_v20 }
 0x229   :  { %1229 = vmatpush3.bf16.msra.mxu1 %v955_v31 }
 0x22a   :  { %1230 = vmatprep.subr.bf16.mxu1 %v1325_v20 }
 0x22d   :  { %1231 = vmatpush3.bf16.msra.mxu1 %v954_v33 }
 0x22e   :  { %1232 = vmatprep.subr.bf16.mxu1 %v1325_v20 }
 0x231   :  { %1233 = vmatpush3.bf16.msra.mxu1 %v953_v58 }
 0x232   :  { %1234 = vmatprep.subr.bf16.mxu1 %v1325_v20 }
 0x235   :  { %1235 = vmatpush3.bf16.msra.mxu1 %v952_v7 }
 0x238   :  { %1237 = vmatmul.mubr.msk.bf16.vlgmr.msra.gmra.mxu1 %vm977_vm5, %v1323_v39 }
 0x2f8   :  { %v1019_v35 = vpop.f32.mrf.mxu1 }
 0x2f9   :  { %v1020_v27 = vadd.f32 %v1019_v35, %v965_v59 }
 0x2fa   :  { %v1238_v60 = vpop.f32.mrf.mxu1 }
 0x2fb   :  { %1026 = vst [vmem:[%s1750_s7] sm:$0xff] %v1020_v27 }
 0x2fc   :  { %v1022_v34 = vpop.f32.mrf.mxu1 }
 0x2fd   :  { %v1023_v9 = vadd.f32 %v1022_v34, %v970_v61 }
 0x2fe   :  { %v1239_v15 = vpop.f32.mrf.mxu1 }
 0x2ff   :  { %1027 = vst [vmem:[%s1750_s7 + $0x8] sm:$0x3] %v1023_v9 }

</bundles_post_ra>
